<compile_context>
chip_gen: v5e
topology: v5e:2x2
jax: 0.10.0
libtpu: 0.0.40
codegen_flags: <defaults>
</compile_context>

<pallas_src>
import functools

import jax
import jax.numpy as jnp
from jax.experimental import pallas as pl
from jax.experimental.pallas import tpu as pltpu


def _round_up(x, m):
    return (x + m - 1) // m * m


# ----------------------------------------------------------------------------
# Pass 1: conv matmul (bf16 operands, f32 acc) + per-tile channel sum / sum-sq
# ----------------------------------------------------------------------------
def _conv_stats_kernel(p_ref, w_ref, sum_ref, sq_ref):
    conv = jnp.dot(p_ref[...], w_ref[...],
                   preferred_element_type=jnp.float32)        # (tm, Cp)  MXU
    sum_ref[...] = jnp.sum(conv, axis=0, keepdims=True)       # (1, Cp)
    sq_ref[...] = jnp.sum(conv * conv, axis=0, keepdims=True)  # (1, Cp)


# ----------------------------------------------------------------------------
# Pass 2: conv matmul + folded BN (per-channel scale/shift) + LeakyReLU(0.2)
# ----------------------------------------------------------------------------
def _conv_apply_kernel(p_ref, w_ref, s_ref, t_ref, o_ref, *, slope):
    conv = jnp.dot(p_ref[...], w_ref[...],
                   preferred_element_type=jnp.float32)        # (tm, Cp)  MXU
    y = conv * s_ref[...] + t_ref[...]                        # folded BN + affine
    o_ref[...] = jnp.where(y >= 0.0, y, slope * y)            # LeakyReLU(0.2)


# ----------------------------------------------------------------------------
# wrapper
# ----------------------------------------------------------------------------
def blocks_forward(params, x_nchw, *, eps=1e-5, slope=0.2):
    """Pallas forward for `Blocks`. x_nchw: (B, Cin, H, W) -> (B, Cout, Ho, Wo)."""
    stride = 2                                   # Conv2d hard-codes stride=2 in the source
    B, Cin, H, W = x_nchw.shape
    w = params["conv_w"]                         # (3, 3, Cin, Cout)  (HWIO)
    Cout = w.shape[-1]
    Ho = (H + 2 - 3) // stride + 1
    Wo = (W + 2 - 3) // stride + 1

    # NCHW -> NHWC, pad=1, extract the nine stride-2 shifted views (im2col).
    # Patch order along the last dim: (dy, dx, ci) == conv_w.reshape(9*Cin, Cout) order.
    x = jnp.transpose(x_nchw, (0, 2, 3, 1)).astype(jnp.float32)
    xp = jnp.pad(x, ((0, 0), (1, 1), (1, 1), (0, 0)))
    cols = [xp[:, dy:dy + stride * (Ho - 1) + 1:stride,
                  dx:dx + stride * (Wo - 1) + 1:stride, :]
            for dy in range(3) for dx in range(3)]
    patches = jnp.concatenate(cols, axis=-1).reshape(B * Ho * Wo, 9 * Cin)

    M, K = patches.shape
    Cp = _round_up(Cout, 128)                    # lane-dense output channels
    tm = 512 if M >= 512 else _round_up(M, 16)   # row tile (bf16 sublane friendly)
    M_pad = _round_up(M, tm)
    nM = M_pad // tm

    # Zero-padded rows contribute exactly 0 to sum / sum-sq (no conv bias in-kernel),
    # so stats stay correct as long as we divide by the true M below.
    patches_bf = jnp.pad(patches, ((0, M_pad - M), (0, 0))).astype(jnp.bfloat16)
    w2 = jnp.pad(w.reshape(K, Cout).astype(jnp.float32),
                 ((0, 0), (0, Cp - Cout))).astype(jnp.bfloat16)
    g = jnp.pad(params["bn_g"].astype(jnp.float32), (0, Cp - Cout))
    b = jnp.pad(params["bn_b"].astype(jnp.float32), (0, Cp - Cout))

    cparams = pltpu.CompilerParams(dimension_semantics=("parallel",))

    # --- pass 1: per-tile partial channel statistics -------------------------
    sums, sqs = pl.pallas_call(
        _conv_stats_kernel,
        out_shape=(jax.ShapeDtypeStruct((nM, 1, Cp), jnp.float32),
                   jax.ShapeDtypeStruct((nM, 1, Cp), jnp.float32)),
        grid=(nM,),
        in_specs=[
            pl.BlockSpec((tm, K), lambda i: (i, 0)),
            pl.BlockSpec((K, Cp), lambda i: (0, 0)),       # resident across all tiles
        ],
        out_specs=(
            pl.BlockSpec((None, 1, Cp), lambda i: (i, 0, 0)),
            pl.BlockSpec((None, 1, Cp), lambda i: (i, 0, 0)),
        ),
        compiler_params=cparams,
    )(patches_bf, w2)

    # --- fold BN + affine into one per-channel scale/shift (tiny, host side) --
    mean = jnp.sum(sums, axis=(0, 1)) / M                      # (Cp,)
    ex2 = jnp.sum(sqs, axis=(0, 1)) / M
    var = jnp.maximum(ex2 - mean * mean, 0.0)                  # biased 1/M variance
    scale = g * jax.lax.rsqrt(var + eps)
    shift = b - mean * scale
    scale = scale.reshape(1, Cp)
    shift = shift.reshape(1, Cp)

    # --- pass 2: conv (recompute) + folded BN + LeakyReLU ---------------------
    out = pl.pallas_call(
        functools.partial(_conv_apply_kernel, slope=slope),
        out_shape=jax.ShapeDtypeStruct((M_pad, Cp), jnp.float32),
        grid=(nM,),
        in_specs=[
            pl.BlockSpec((tm, K), lambda i: (i, 0)),
            pl.BlockSpec((K, Cp), lambda i: (0, 0)),
            pl.BlockSpec((1, Cp), lambda i: (0, 0)),
            pl.BlockSpec((1, Cp), lambda i: (0, 0)),
        ],
        out_specs=pl.BlockSpec((tm, Cp), lambda i: (i, 0)),
        compiler_params=cparams,
    )(patches_bf, w2, scale, shift)

    out = out[:M, :Cout].reshape(B, Ho, Wo, Cout)
    return jnp.transpose(out, (0, 3, 1, 2))      # NHWC -> NCHW


# ----------------------------------------------------------------------------
# pure-JAX reference (faithful f32 path, including the conv bias)
# ----------------------------------------------------------------------------
def _reference_forward(params, x_nchw, *, eps=1e-5, slope=0.2):
    w_oihw = jnp.transpose(params["conv_w"], (3, 2, 0, 1))   # HWIO -> OIHW
    y = jax.lax.conv_general_dilated(
        x_nchw.astype(jnp.float32), w_oihw,
        window_strides=(2, 2), padding=((1, 1), (1, 1)),
        dimension_numbers=("NCHW", "OIHW", "NCHW"))
    y = y + params["conv_b"].reshape(1, -1, 1, 1)
    mean = jnp.mean(y, axis=(0, 2, 3), keepdims=True)
    var = jnp.mean((y - mean) ** 2, axis=(0, 2, 3), keepdims=True)
    y = (y - mean) * jax.lax.rsqrt(var + eps)
    y = y * params["bn_g"].reshape(1, -1, 1, 1) + params["bn_b"].reshape(1, -1, 1, 1)
    return jnp.where(y >= 0.0, y, slope * y)


# ----------------------------------------------------------------------------
# deterministic parameter init (PyTorch-like defaults)
# ----------------------------------------------------------------------------
def init_blocks_params(key, in_channels, out_channels):
    k1, k2 = jax.random.split(key)
    fan_in = in_channels * 9
    bound = 1.0 / (fan_in ** 0.5)
    conv_w = jax.random.uniform(k1, (3, 3, in_channels, out_channels),
                                jnp.float32, -bound, bound)
    conv_b = jax.random.uniform(k2, (out_channels,), jnp.float32, -bound, bound)
    # TODO(synk): BatchNorm running_mean/running_var buffers are not tracked/updated;
    #             they do not affect the training-mode forward output.
    return dict(conv_w=conv_w, conv_b=conv_b,
                bn_g=jnp.ones((out_channels,), jnp.float32),
                bn_b=jnp.zeros((out_channels,), jnp.float32))


# ----------------------------------------------------------------------------
if __name__ == "__main__":
    key = jax.random.PRNGKey(0)
    pkey, xkey = jax.random.split(key)

    B, Cin, Cout, H, W = 2, 4, 16, 16, 16
    params = init_blocks_params(pkey, Cin, Cout)
    x = jax.random.normal(xkey, (B, Cin, H, W), jnp.float32)   # NCHW, like PyTorch

    fwd = jax.jit(lambda inp: blocks_forward(params, inp))
    y = fwd(x)
    jax.block_until_ready(y)

    y_ref = _reference_forward(params, x)
    assert y.shape == (B, Cout, H // 2, W // 2)
    assert bool(jnp.all(jnp.isfinite(y)))
    # bf16 MXU operands with f32 accumulation -> slightly looser tolerance than pure f32.
    assert bool(jnp.allclose(y, y_ref, atol=2e-2, rtol=2e-2))
    print("KERNEL_OK")
</pallas_src>

<mosaic_0001>
module attributes {stable_mosaic.version = 11 : i64} {
  func.func @_conv_stats_kernel(%arg0: i32, %arg1: memref<128x36xbf16, #tpu.memory_space<vmem>>, %arg2: memref<36x128xbf16, #tpu.memory_space<vmem>>, %arg3: memref<1x1x128xf32, #tpu.memory_space<vmem>>, %arg4: memref<1x1x128xf32, #tpu.memory_space<vmem>>) attributes {dimension_semantics = [#tpu.dimension_semantics<parallel>], iteration_bounds = array<i64: 1>, scalar_prefetch = 0 : i64, scratch_operands = 0 : i64, tpu.core_type = #tpu.core_type<tc>, window_params = [{transform_indices = @transform_0, window_bounds = array<i64: 128, 36>}, {pipeline_mode = #tpu.pipeline_mode<synchronous>, transform_indices = @transform_1, window_bounds = array<i64: 36, 128>}, {transform_indices = @transform_2, window_bounds = array<i64: 1, 1, 128>}, {transform_indices = @transform_3, window_bounds = array<i64: 1, 1, 128>}]} {
    %c0 = arith.constant 0 : index
    %c0_0 = arith.constant 0 : index
    %0 = vector.load %arg1[%c0, %c0_0] : memref<128x36xbf16, #tpu.memory_space<vmem>>, vector<128x36xbf16>
    %c0_1 = arith.constant 0 : index
    %c0_2 = arith.constant 0 : index
    %1 = vector.load %arg2[%c0_1, %c0_2] : memref<36x128xbf16, #tpu.memory_space<vmem>>, vector<36x128xbf16>
    %cst = arith.constant dense<0.000000e+00> : vector<128x128xf32>
    %2 = tpu.matmul %0, %1, %cst {dimension_numbers = #tpu.dot_dimension_numbers<[1], [0], [0], [1], [0, 0, 1, 1], [], []>} : vector<128x36xbf16>, vector<36x128xbf16>, vector<128x128xf32> -> vector<128x128xf32>
    %cst_3 = arith.constant dense<0.000000e+00> : vector<128xf32>
    %3 = vector.multi_reduction <add>, %2, %cst_3 [0] : vector<128x128xf32> to vector<128xf32>
    %4 = vector.shape_cast %3 : vector<128xf32> to vector<1x128xf32>
    %c0_4 = arith.constant 0 : index
    %c0_5 = arith.constant 0 : index
    %c0_6 = arith.constant 0 : index
    %5 = vector.load %arg3[%c0_4, %c0_5, %c0_6] : memref<1x1x128xf32, #tpu.memory_space<vmem>>, vector<1x1x128xf32>
    %6 = vector.shape_cast %5 : vector<1x1x128xf32> to vector<1x128xf32>
    %7 = vector.shape_cast %4 : vector<1x128xf32> to vector<1x1x128xf32>
    tpu.vector_store %arg3[%c0_4, %c0_5, %c0_6], %7 {strides = array<i32>} : memref<1x1x128xf32, #tpu.memory_space<vmem>>, vector<1x1x128xf32>,
    %8 = arith.mulf %2, %2 : vector<128x128xf32>
    %cst_7 = arith.constant dense<0.000000e+00> : vector<128xf32>
    %9 = vector.multi_reduction <add>, %8, %cst_7 [0] : vector<128x128xf32> to vector<128xf32>
    %10 = vector.shape_cast %9 : vector<128xf32> to vector<1x128xf32>
    %c0_8 = arith.constant 0 : index
    %c0_9 = arith.constant 0 : index
    %c0_10 = arith.constant 0 : index
    %11 = vector.load %arg4[%c0_8, %c0_9, %c0_10] : memref<1x1x128xf32, #tpu.memory_space<vmem>>, vector<1x1x128xf32>
    %12 = vector.shape_cast %11 : vector<1x1x128xf32> to vector<1x128xf32>
    %13 = vector.shape_cast %10 : vector<1x128xf32> to vector<1x1x128xf32>
    tpu.vector_store %arg4[%c0_8, %c0_9, %c0_10], %13 {strides = array<i32>} : memref<1x1x128xf32, #tpu.memory_space<vmem>>, vector<1x1x128xf32>,
    return
  }
  func.func @transform_0(%arg0: i32) -> (i32, i32) {
    %c0_i32 = arith.constant 0 : i32
    %c0_i32_0 = arith.constant 0 : i32
    return %arg0, %c0_i32 : i32, i32
  }
  func.func @transform_1(%arg0: i32) -> (i32, i32) {
    %c0_i32 = arith.constant 0 : i32
    %c0_i32_0 = arith.constant 0 : i32
    %c0_i32_1 = arith.constant 0 : i32
    return %c0_i32, %c0_i32_0 : i32, i32
  }
  func.func @transform_2(%arg0: i32) -> (i32, i32, i32) {
    %c0_i32 = arith.constant 0 : i32
    %c0_i32_0 = arith.constant 0 : i32
    %c0_i32_1 = arith.constant 0 : i32
    return %arg0, %c0_i32, %c0_i32_0 : i32, i32, i32
  }
  func.func @transform_3(%arg0: i32) -> (i32, i32, i32) {
    %c0_i32 = arith.constant 0 : i32
    %c0_i32_0 = arith.constant 0 : i32
    %c0_i32_1 = arith.constant 0 : i32
    return %arg0, %c0_i32, %c0_i32_0 : i32, i32, i32
  }
}

module attributes {stable_mosaic.version = 11 : i64} {
  func.func @_conv_apply_kernel(%arg0: i32, %arg1: memref<128x36xbf16, #tpu.memory_space<vmem>>, %arg2: memref<36x128xbf16, #tpu.memory_space<vmem>>, %arg3: memref<1x128xf32, #tpu.memory_space<vmem>>, %arg4: memref<1x128xf32, #tpu.memory_space<vmem>>, %arg5: memref<128x128xf32, #tpu.memory_space<vmem>>) attributes {dimension_semantics = [#tpu.dimension_semantics<parallel>], iteration_bounds = array<i64: 1>, scalar_prefetch = 0 : i64, scratch_operands = 0 : i64, tpu.core_type = #tpu.core_type<tc>, window_params = [{transform_indices = @transform_0, window_bounds = array<i64: 128, 36>}, {pipeline_mode = #tpu.pipeline_mode<synchronous>, transform_indices = @transform_1, window_bounds = array<i64: 36, 128>}, {pipeline_mode = #tpu.pipeline_mode<synchronous>, transform_indices = @transform_2, window_bounds = array<i64: 1, 128>}, {pipeline_mode = #tpu.pipeline_mode<synchronous>, transform_indices = @transform_3, window_bounds = array<i64: 1, 128>}, {transform_indices = @transform_4, window_bounds = array<i64: 128, 128>}]} {
    %c0 = arith.constant 0 : index
    %c0_0 = arith.constant 0 : index
    %0 = vector.load %arg1[%c0, %c0_0] : memref<128x36xbf16, #tpu.memory_space<vmem>>, vector<128x36xbf16>
    %c0_1 = arith.constant 0 : index
    %c0_2 = arith.constant 0 : index
    %1 = vector.load %arg2[%c0_1, %c0_2] : memref<36x128xbf16, #tpu.memory_space<vmem>>, vector<36x128xbf16>
    %cst = arith.constant dense<0.000000e+00> : vector<128x128xf32>
    %2 = tpu.matmul %0, %1, %cst {dimension_numbers = #tpu.dot_dimension_numbers<[1], [0], [0], [1], [0, 0, 1, 1], [], []>} : vector<128x36xbf16>, vector<36x128xbf16>, vector<128x128xf32> -> vector<128x128xf32>
    %c0_3 = arith.constant 0 : index
    %c0_4 = arith.constant 0 : index
    %3 = vector.load %arg3[%c0_3, %c0_4] : memref<1x128xf32, #tpu.memory_space<vmem>>, vector<1x128xf32>
    %4 = vector.broadcast %3 : vector<1x128xf32> to vector<128x128xf32>
    %5 = arith.mulf %2, %4 : vector<128x128xf32>
    %c0_5 = arith.constant 0 : index
    %c0_6 = arith.constant 0 : index
    %6 = vector.load %arg4[%c0_5, %c0_6] : memref<1x128xf32, #tpu.memory_space<vmem>>, vector<1x128xf32>
    %7 = vector.broadcast %6 : vector<1x128xf32> to vector<128x128xf32>
    %8 = arith.addf %5, %7 : vector<128x128xf32>
    %cst_7 = arith.constant 0.000000e+00 : f32
    %9 = vector.broadcast %cst_7 : f32 to vector<128x128xf32>
    %10 = arith.cmpf oge, %8, %9 : vector<128x128xf32>
    %cst_8 = arith.constant 2.000000e-01 : f32
    %11 = vector.broadcast %cst_8 : f32 to vector<128x128xf32>
    %12 = arith.mulf %11, %8 : vector<128x128xf32>
    %13 = arith.select %10, %8, %12 : vector<128x128xi1>, vector<128x128xf32>
    %c0_9 = arith.constant 0 : index
    %c0_10 = arith.constant 0 : index
    %14 = vector.load %arg5[%c0_9, %c0_10] : memref<128x128xf32, #tpu.memory_space<vmem>>, vector<128x128xf32>
    tpu.vector_store %arg5[%c0_9, %c0_10], %13 {strides = array<i32>} : memref<128x128xf32, #tpu.memory_space<vmem>>, vector<128x128xf32>,
    return
  }
  func.func @transform_0(%arg0: i32) -> (i32, i32) {
    %c0_i32 = arith.constant 0 : i32
    %c0_i32_0 = arith.constant 0 : i32
    return %arg0, %c0_i32 : i32, i32
  }
  func.func @transform_1(%arg0: i32) -> (i32, i32) {
    %c0_i32 = arith.constant 0 : i32
    %c0_i32_0 = arith.constant 0 : i32
    %c0_i32_1 = arith.constant 0 : i32
    return %c0_i32, %c0_i32_0 : i32, i32
  }
  func.func @transform_2(%arg0: i32) -> (i32, i32) {
    %c0_i32 = arith.constant 0 : i32
    %c0_i32_0 = arith.constant 0 : i32
    %c0_i32_1 = arith.constant 0 : i32
    return %c0_i32, %c0_i32_0 : i32, i32
  }
  func.func @transform_3(%arg0: i32) -> (i32, i32) {
    %c0_i32 = arith.constant 0 : i32
    %c0_i32_0 = arith.constant 0 : i32
    %c0_i32_1 = arith.constant 0 : i32
    return %c0_i32, %c0_i32_0 : i32, i32
  }
  func.func @transform_4(%arg0: i32) -> (i32, i32) {
    %c0_i32 = arith.constant 0 : i32
    %c0_i32_0 = arith.constant 0 : i32
    return %arg0, %c0_i32 : i32, i32
  }
}

</mosaic_0001>

<bundles_post_ra>
// kernel: _lambda_.2
= control target key start
LH: loop header
LB: loop body
LE: loop exit
PB: predicated region body
PF: predicated region fallthrough
CT: control target
= control target key end

     0   :  { %vm115_vm0 = vcmask 1041408   ;;  %vm90_vm1 = vcmask 293888   ;;  %s370_s1 = inlined_call_operand.vmem [shape: bf16[36,128], index: 1, kind: input, shape index: {}]   ;;  %s371_s0 = inlined_call_operand.vmem [shape: bf16[128,36], index: 0, kind: input, shape index: {}]   ;;  %s372_s2 = inlined_call_operand.vmem [shape: f32[1,1,128], index: 2, kind: output, shape index: {0}]   ;;  %s373_s3 = inlined_call_operand.vmem [shape: f32[1,1,128], index: 3, kind: output, shape index: {1}]  }
   0x1   :  { %v34_v0 = vld [vmem:[%s370_s1 + $0x10] sm:$0x3]  ;;  %v293_v4 = vld [vmem:[%s370_s1 + $0x8] sm:$0xff]  ;;  %v292_v5 = vld [vmem:[%s370_s1] sm:$0xff] }
   0x2   :  { %v84_v1 = vunpack.c.l.b16 %v34_v0  ;;  %v284_v6 = vld [vmem:[%s371_s0] sm:$0xff]  ;;  %v286_v7 = vld [vmem:[%s371_s0 + $0x10] sm:$0xff]  ;;  %v285_v10 = vld [vmem:[%s371_s0 + $0x8] sm:$0xff] }
   0x3   :  { %v288_v8 = vld [vmem:[%s371_s0 + $0x20] sm:$0xff]  ;;  %v290_v9 = vld [vmem:[%s371_s0 + $0x30] sm:$0xff]  ;;  %v287_v11 = vld [vmem:[%s371_s0 + $0x18] sm:$0xff] }
   0x4   :  { %v87_v2 = vpack.c.b16 %v84_v1, %v84_v1  ;;  %v289_v12 = vld [vmem:[%s371_s0 + $0x28] sm:$0xff]  ;;  %v291_v13 = vld [vmem:[%s371_s0 + $0x38] sm:$0xff] }
   0x6   :  { %v117_v3 = vsel %vm115_vm0, %v87_v2, 0 }
   0x7   :  { %124 = vmatpush.bf16.msra.mxu0 %v117_v3  ;;  %294 = vmatpush.bf16.msra.mxu1 %v117_v3 }
   0x8   :  { %295 = vmatpush.bf16.msra.mxu2 %v117_v3  ;;  %296 = vmatpush.bf16.msra.mxu3 %v117_v3 }
   0xb   :  { %125 = vmatpush.bf16.msra.mxu0 %v293_v4  ;;  %297 = vmatpush.bf16.msra.mxu1 %v293_v4 }
   0xc   :  { %298 = vmatpush.bf16.msra.mxu2 %v293_v4  ;;  %299 = vmatpush.bf16.msra.mxu3 %v293_v4 }
   0xf   :  { %126 = vmatpush.bf16.msra.mxu0 %v292_v5  ;;  %300 = vmatpush.bf16.msra.mxu1 %v292_v5 }
  0x10   :  { %301 = vmatpush.bf16.msra.mxu2 %v292_v5  ;;  %302 = vmatpush.bf16.msra.mxu3 %v292_v5 }
  0x12   :  { %276 = vmatmul.msk.bf16.vlgmr.msra.gmra.mxu0 %vm90_vm1, %v284_v6  ;;  %278 = vmatmul.msk.bf16.vlgmr.msra.gmra.mxu1 %vm90_vm1, %v286_v7 }
  0x13   :  { %280 = vmatmul.msk.bf16.vlgmr.msra.gmra.mxu2 %vm90_vm1, %v288_v8  ;;  %282 = vmatmul.msk.bf16.vlgmr.msra.gmra.mxu3 %vm90_vm1, %v290_v9 }
  0x22   :  { %277 = vmatmul.msk.bf16.gmra.mxu0 %vm90_vm1, %v285_v10  ;;  %279 = vmatmul.msk.bf16.gmra.mxu1 %vm90_vm1, %v287_v11 }
  0x23   :  { %281 = vmatmul.msk.bf16.gmra.mxu2 %vm90_vm1, %v289_v12  ;;  %283 = vmatmul.msk.bf16.gmra.mxu3 %vm90_vm1, %v291_v13 }
  0x8f   :  { %v128_v14 = vpop.f32.mrf.mxu0  ;;  %v138_v15 = vpop.f32.mrf.mxu1 }
  0x90   :  { %v190_v24 = vmul.f32 %v128_v14, %v128_v14  ;;  %v194_v34 = vmul.f32 %v138_v15, %v138_v15 }
  0x96   :  { %v148_v17 = vpop.f32.mrf.mxu2  ;;  %v158_v20 = vpop.f32.mrf.mxu3 }
  0x97   :  { %v130_v16 = vpop.f32.mrf.mxu0  ;;  %v140_v18 = vpop.f32.mrf.mxu1  ;;  %v198_v48 = vmul.f32 %v148_v17, %v148_v17  ;;  %v202_v62 = vmul.f32 %v158_v20, %v158_v20 }
  0x98   :  { %v191_v22 = vmul.f32 %v130_v16, %v130_v16  ;;  %v168_v25 = vadd.f32 %v130_v16, %v128_v14  ;;  %v195_v38 = vmul.f32 %v140_v18, %v140_v18 }
  0x9a   :  { %v206_v27 = vadd.f32 %v191_v22, %v190_v24 }
  0x9e   :  { %v150_v21 = vpop.f32.mrf.mxu2  ;;  %v160_v33 = vpop.f32.mrf.mxu3 }
  0x9f   :  { %v133_v19 = vpop.f32.mrf.mxu0  ;;  %v143_v23 = vpop.f32.mrf.mxu1  ;;  %v199_v52 = vmul.f32 %v150_v21, %v150_v21  ;;  %v203_v1 = vmul.f32 %v160_v33, %v160_v33 }
  0xa0   :  { %v192_v26 = vmul.f32 %v133_v19, %v133_v19  ;;  %v169_v28 = vadd.f32 %v168_v25, %v133_v19  ;;  %v196_v42 = vmul.f32 %v143_v23, %v143_v23 }
  0xa2   :  { %v207_v30 = vadd.f32 %v206_v27, %v192_v26 }
  0xa6   :  { %v153_v37 = vpop.f32.mrf.mxu2  ;;  %v163_v51 = vpop.f32.mrf.mxu3 }
  0xa7   :  { %v135_v29 = vpop.f32.mrf.mxu0  ;;  %v145_v41 = vpop.f32.mrf.mxu1  ;;  %v200_v57 = vmul.f32 %v153_v37, %v153_v37  ;;  %v204_v6 = vmul.f32 %v163_v51, %v163_v51 }
  0xa8   :  { %v170_v31 = vadd.f32 %v169_v28, %v135_v29  ;;  %v193_v32 = vmul.f32 %v135_v29, %v135_v29  ;;  %v197_v46 = vmul.f32 %v145_v41, %v145_v41 }
  0xaa   :  { %v171_v35 = vadd.f32 %v170_v31, %v138_v15  ;;  %v208_v36 = vadd.f32 %v207_v30, %v193_v32 }
  0xac   :  { %v209_v39 = vadd.f32 %v208_v36, %v194_v34  ;;  %v172_v40 = vadd.f32 %v171_v35, %v140_v18 }
  0xae   :  { %v173_v43 = vadd.f32 %v172_v40, %v143_v23  ;;  %v210_v44 = vadd.f32 %v209_v39, %v195_v38  ;;  %v155_v55 = vpop.f32.mrf.mxu2  ;;  %v165_v4 = vpop.f32.mrf.mxu3 }
  0xaf   :  { %v201_v61 = vmul.f32 %v155_v55, %v155_v55  ;;  %v205_v10 = vmul.f32 %v165_v4, %v165_v4 }
  0xb0   :  { %v174_v45 = vadd.f32 %v173_v43, %v145_v41  ;;  %v211_v47 = vadd.f32 %v210_v44, %v196_v42 }
  0xb2   :  { %v175_v49 = vadd.f32 %v174_v45, %v148_v17  ;;  %v212_v50 = vadd.f32 %v211_v47, %v197_v46 }
  0xb4   :  { %v213_v53 = vadd.f32 %v212_v50, %v198_v48  ;;  %v176_v54 = vadd.f32 %v175_v49, %v150_v21 }
  0xb6   :  { %v177_v56 = vadd.f32 %v176_v54, %v153_v37  ;;  %v214_v58 = vadd.f32 %v213_v53, %v199_v52 }
  0xb8   :  { %v215_v59 = vadd.f32 %v214_v58, %v200_v57  ;;  %v178_v60 = vadd.f32 %v177_v56, %v155_v55 }
  0xba   :  { %v179_v63 = vadd.f32 %v178_v60, %v158_v20  ;;  %v216_v0 = vadd.f32 %v215_v59, %v201_v61 }
  0xbc   :  { %v217_v2 = vadd.f32 %v216_v0, %v202_v62  ;;  %v180_v3 = vadd.f32 %v179_v63, %v160_v33 }
  0xbe   :  { %v181_v5 = vadd.f32 %v180_v3, %v163_v51  ;;  %v218_v7 = vadd.f32 %v217_v2, %v203_v1 }
  0xc0   :  { %v219_v8 = vadd.f32 %v218_v7, %v204_v6  ;;  %v182_v9 = vadd.f32 %v181_v5, %v165_v4 }
  0xc2   :  { %v183_v11 = vrot.slane %v182_v9, 4  ;;  %v220_v12 = vadd.f32 %v219_v8, %v205_v10 }
  0xc4   :  { %v184_v13 = vadd.f32 %v183_v11, %v182_v9  ;;  %v221_v14 = vrot.slane %v220_v12, 4 }
  0xc6   :  { %v185_v15 = vrot.slane %v184_v13, 2  ;;  %v222_v16 = vadd.f32 %v221_v14, %v220_v12 }
  0xc8   :  { %v186_v17 = vadd.f32 %v185_v15, %v184_v13  ;;  %v223_v18 = vrot.slane %v222_v16, 2 }
  0xca   :  { %v187_v19 = vrot.slane %v186_v17, 1  ;;  %v224_v20 = vadd.f32 %v223_v18, %v222_v16 }
  0xcc   :  { %v188_v21 = vadd.f32 %v187_v19, %v186_v17  ;;  %v225_v22 = vrot.slane %v224_v20, 1 }
  0xce   :  { %189 = vst [vmem:[%s372_s2] sm:$0x1] %v188_v21  ;;  %v226_v23 = vadd.f32 %v225_v22, %v224_v20 }
  0xd0   :  { %227 = vst [vmem:[%s373_s3] sm:$0x1] %v226_v23 }

// kernel: _lambda_.3
= control target key start
LH: loop header
LB: loop body
LE: loop exit
PB: predicated region body
PF: predicated region fallthrough
CT: control target
= control target key end

     0   :  { %vm120_vm0 = vcmask 1041408   ;;  %s507_s0 = inlined_call_operand.vmem [shape: bf16[128,36], index: 0, kind: input, shape index: {}]   ;;  %s508_s1 = inlined_call_operand.vmem [shape: bf16[36,128], index: 1, kind: input, shape index: {}]   ;;  %s509_s2 = inlined_call_operand.vmem [shape: f32[1,128], index: 2, kind: input, shape index: {}]   ;;  %s510_s3 = inlined_call_operand.vmem [shape: f32[1,128], index: 3, kind: input, shape index: {}]   ;;  %s511_s4 = inlined_call_operand.hbm [shape: f32[128,128], index: 4, kind: output, shape index: {}]  }
   0x1   :  { %v39_v0 = vld [vmem:[%s508_s1 + $0x10] sm:$0x3] }
   0x2   :  { %v89_v1 = vunpack.c.l.b16 %v39_v0 }
   0x4   :  { %v92_v2 = vpack.c.b16 %v89_v1, %v89_v1 }
   0x5   :  { %9 = vsyncpa [#allocation3], 0  ;;  %v352_v4 = vld [vmem:[%s508_s1 + $0x8] sm:$0xff]  ;;  %v351_v5 = vld [vmem:[%s508_s1] sm:$0xff]  ;;  %vm95_vm1 = vcmask 293888   ;;  %s283_s15 = sshll.u32 %s511_s4, 4  ;;  %s284_s15 = int_to_ptr.hbm [resolvable:$true] %s283_s15 }
   0x6   :  { %v122_v3 = vsel %vm120_vm0, %v92_v2, 0  ;;  %v343_v6 = vld [vmem:[%s507_s0] sm:$0xff]  ;;  %v345_v7 = vld [vmem:[%s507_s0 + $0x10] sm:$0xff]  ;;  %v344_v10 = vld [vmem:[%s507_s0 + $0x8] sm:$0xff]  ;;  %s394_s16 = smov 128   ;;  %s395_s17 = smov 8  }
   0x7   :  { %129 = vmatpush.bf16.msra.mxu0 %v122_v3  ;;  %353 = vmatpush.bf16.msra.mxu1 %v122_v3  ;;  %v347_v8 = vld [vmem:[%s507_s0 + $0x20] sm:$0xff]  ;;  %v349_v9 = vld [vmem:[%s507_s0 + $0x30] sm:$0xff]  ;;  %v346_v11 = vld [vmem:[%s507_s0 + $0x18] sm:$0xff] }
   0x8   :  { %354 = vmatpush.bf16.msra.mxu2 %v122_v3  ;;  %355 = vmatpush.bf16.msra.mxu3 %v122_v3  ;;  %v348_v12 = vld [vmem:[%s507_s0 + $0x28] sm:$0xff]  ;;  %v350_v13 = vld [vmem:[%s507_s0 + $0x38] sm:$0xff]  ;;  %v465_v14 = vld [vmem:[%s509_s2] ss:$0 sm:$0xff]  ;;  %s393_s0 = smov [#allocation2]  }
   0x9   :  { %v470_v15 = vld [vmem:[%s510_s3] ss:$0 sm:$0xff]  ;;  %s281_s2 = sshll.u32 %s393_s0, 4  ;;  %s282_s2 = int_to_ptr.vmem [resolvable:$true] %s281_s2 }
   0xb   :  { %130 = vmatpush.bf16.msra.mxu0 %v352_v4  ;;  %356 = vmatpush.bf16.msra.mxu1 %v352_v4 }
   0xc   :  { %357 = vmatpush.bf16.msra.mxu2 %v352_v4  ;;  %358 = vmatpush.bf16.msra.mxu3 %v352_v4 }
   0xf   :  { %131 = vmatpush.bf16.msra.mxu0 %v351_v5  ;;  %359 = vmatpush.bf16.msra.mxu1 %v351_v5 }
  0x10   :  { %360 = vmatpush.bf16.msra.mxu2 %v351_v5  ;;  %361 = vmatpush.bf16.msra.mxu3 %v351_v5 }
  0x12   :  { %335 = vmatmul.msk.bf16.vlgmr.msra.gmra.mxu0 %vm95_vm1, %v343_v6  ;;  %337 = vmatmul.msk.bf16.vlgmr.msra.gmra.mxu1 %vm95_vm1, %v345_v7 }
  0x13   :  { %339 = vmatmul.msk.bf16.vlgmr.msra.gmra.mxu2 %vm95_vm1, %v347_v8  ;;  %341 = vmatmul.msk.bf16.vlgmr.msra.gmra.mxu3 %vm95_vm1, %v349_v9 }
  0x22   :  { %336 = vmatmul.msk.bf16.gmra.mxu0 %vm95_vm1, %v344_v10  ;;  %338 = vmatmul.msk.bf16.gmra.mxu1 %vm95_vm1, %v346_v11 }
  0x23   :  { %340 = vmatmul.msk.bf16.gmra.mxu2 %vm95_vm1, %v348_v12  ;;  %342 = vmatmul.msk.bf16.gmra.mxu3 %vm95_vm1, %v350_v13 }
  0x8f   :  { %v133_v16 = vpop.f32.mrf.mxu0  ;;  %v143_v17 = vpop.f32.mrf.mxu1 }
  0x90   :  { %v177_v18 = vmul.f32 %v465_v14, %v133_v16  ;;  %v181_v19 = vmul.f32 %v465_v14, %v143_v17 }
  0x92   :  { %v197_v20 = vadd.f32 %v470_v15, %v177_v18  ;;  %v201_v21 = vadd.f32 %v470_v15, %v181_v19 }
  0x94   :  { %vm213_vm2 = vcmp.ge.f32.partialorder %v197_v20, 0.0  ;;  %v229_v22 = vmul.f32 0.2, %v197_v20  ;;  %vm217_vm3 = vcmp.ge.f32.partialorder %v201_v21, 0.0  ;;  %v233_v23 = vmul.f32 0.2, %v201_v21 }
  0x96   :  { %v245_v24 = vsel %vm213_vm2, %v197_v20, %v229_v22  ;;  %v249_v25 = vsel %vm217_vm3, %v201_v21, %v233_v23  ;;  %v153_v26 = vpop.f32.mrf.mxu2  ;;  %v163_v27 = vpop.f32.mrf.mxu3 }
  0x97   :  { %261 = vst [vmem:[#allocation2] sm:$0xff] %v245_v24  ;;  %v185_v28 = vmul.f32 %v465_v14, %v153_v26  ;;  %v189_v29 = vmul.f32 %v465_v14, %v163_v27  ;;  %v135_v30 = vpop.f32.mrf.mxu0  ;;  %v145_v31 = vpop.f32.mrf.mxu1 }
  0x98   :  { %265 = vst [vmem:[#allocation2 + $0x20] sm:$0xff] %v249_v25  ;;  %v178_v32 = vmul.f32 %v465_v14, %v135_v30  ;;  %v182_v33 = vmul.f32 %v465_v14, %v145_v31 }
  0x99   :  { %v205_v34 = vadd.f32 %v470_v15, %v185_v28  ;;  %v209_v35 = vadd.f32 %v470_v15, %v189_v29 }
  0x9a   :  { %v198_v36 = vadd.f32 %v470_v15, %v178_v32  ;;  %v202_v37 = vadd.f32 %v470_v15, %v182_v33 }
  0x9b   :  { %vm221_vm4 = vcmp.ge.f32.partialorder %v205_v34, 0.0  ;;  %v237_v38 = vmul.f32 0.2, %v205_v34  ;;  %vm225_vm5 = vcmp.ge.f32.partialorder %v209_v35, 0.0  ;;  %v241_v39 = vmul.f32 0.2, %v209_v35 }
  0x9c   :  { %vm214_vm6 = vcmp.ge.f32.partialorder %v198_v36, 0.0  ;;  %v230_v40 = vmul.f32 0.2, %v198_v36  ;;  %vm218_vm7 = vcmp.ge.f32.partialorder %v202_v37, 0.0  ;;  %v234_v41 = vmul.f32 0.2, %v202_v37 }
  0x9d   :  { %v253_v42 = vsel %vm221_vm4, %v205_v34, %v237_v38  ;;  %v257_v43 = vsel %vm225_vm5, %v209_v35, %v241_v39 }
  0x9e   :  { %269 = vst [vmem:[#allocation2 + $0x40] sm:$0xff] %v253_v42  ;;  %v246_v44 = vsel %vm214_vm6, %v198_v36, %v230_v40  ;;  %v250_v45 = vsel %vm218_vm7, %v202_v37, %v234_v41  ;;  %v155_v46 = vpop.f32.mrf.mxu2  ;;  %v165_v47 = vpop.f32.mrf.mxu3 }
  0x9f   :  { %273 = vst [vmem:[#allocation2 + $0x60] sm:$0xff] %v257_v43  ;;  %v186_v48 = vmul.f32 %v465_v14, %v155_v46  ;;  %v190_v49 = vmul.f32 %v465_v14, %v165_v47  ;;  %v138_v50 = vpop.f32.mrf.mxu0  ;;  %v148_v51 = vpop.f32.mrf.mxu1 }
  0xa0   :  { %262 = vst [vmem:[#allocation2 + $0x8] sm:$0xff] %v246_v44  ;;  %v179_v52 = vmul.f32 %v465_v14, %v138_v50  ;;  %v183_v53 = vmul.f32 %v465_v14, %v148_v51 }
  0xa1   :  { %266 = vst [vmem:[#allocation2 + $0x28] sm:$0xff] %v250_v45  ;;  %v206_v54 = vadd.f32 %v470_v15, %v186_v48  ;;  %v210_v55 = vadd.f32 %v470_v15, %v190_v49 }
  0xa2   :  { %v199_v56 = vadd.f32 %v470_v15, %v179_v52  ;;  %v203_v57 = vadd.f32 %v470_v15, %v183_v53 }
  0xa3   :  { %vm222_vm8 = vcmp.ge.f32.partialorder %v206_v54, 0.0  ;;  %v238_v58 = vmul.f32 0.2, %v206_v54  ;;  %vm226_vm9 = vcmp.ge.f32.partialorder %v210_v55, 0.0  ;;  %v242_v59 = vmul.f32 0.2, %v210_v55 }
  0xa4   :  { %vm215_vm10 = vcmp.ge.f32.partialorder %v199_v56, 0.0  ;;  %v231_v60 = vmul.f32 0.2, %v199_v56  ;;  %vm219_vm11 = vcmp.ge.f32.partialorder %v203_v57, 0.0  ;;  %v235_v61 = vmul.f32 0.2, %v203_v57 }
  0xa5   :  { %v254_v62 = vsel %vm222_vm8, %v206_v54, %v238_v58  ;;  %v258_v63 = vsel %vm226_vm9, %v210_v55, %v242_v59 }
  0xa6   :  { %270 = vst [vmem:[#allocation2 + $0x48] sm:$0xff] %v254_v62  ;;  %v247_v0 = vsel %vm215_vm10, %v199_v56, %v231_v60  ;;  %v251_v1 = vsel %vm219_vm11, %v203_v57, %v235_v61  ;;  %v158_v2 = vpop.f32.mrf.mxu2  ;;  %v168_v3 = vpop.f32.mrf.mxu3 }
  0xa7   :  { %274 = vst [vmem:[#allocation2 + $0x68] sm:$0xff] %v258_v63  ;;  %v187_v4 = vmul.f32 %v465_v14, %v158_v2  ;;  %v191_v5 = vmul.f32 %v465_v14, %v168_v3  ;;  %v140_v6 = vpop.f32.mrf.mxu0  ;;  %v150_v7 = vpop.f32.mrf.mxu1 }
  0xa8   :  { %263 = vst [vmem:[#allocation2 + $0x10] sm:$0xff] %v247_v0  ;;  %v180_v8 = vmul.f32 %v465_v14, %v140_v6  ;;  %v184_v9 = vmul.f32 %v465_v14, %v150_v7 }
  0xa9   :  { %267 = vst [vmem:[#allocation2 + $0x30] sm:$0xff] %v251_v1  ;;  %v207_v10 = vadd.f32 %v470_v15, %v187_v4  ;;  %v211_v11 = vadd.f32 %v470_v15, %v191_v5 }
  0xaa   :  { %v200_v12 = vadd.f32 %v470_v15, %v180_v8  ;;  %v204_v13 = vadd.f32 %v470_v15, %v184_v9 }
  0xab   :  { %vm223_vm12 = vcmp.ge.f32.partialorder %v207_v10, 0.0  ;;  %v239_v16 = vmul.f32 0.2, %v207_v10  ;;  %vm227_vm13 = vcmp.ge.f32.partialorder %v211_v11, 0.0  ;;  %v243_v17 = vmul.f32 0.2, %v211_v11 }
  0xac   :  { %vm216_vm14 = vcmp.ge.f32.partialorder %v200_v12, 0.0  ;;  %v232_v18 = vmul.f32 0.2, %v200_v12  ;;  %vm220_vm15 = vcmp.ge.f32.partialorder %v204_v13, 0.0  ;;  %v236_v19 = vmul.f32 0.2, %v204_v13 }
  0xad   :  { %v255_v20 = vsel %vm223_vm12, %v207_v10, %v239_v16  ;;  %v259_v21 = vsel %vm227_vm13, %v211_v11, %v243_v17 }
  0xae   :  { %271 = vst [vmem:[#allocation2 + $0x50] sm:$0xff] %v255_v20  ;;  %v248_v22 = vsel %vm216_vm14, %v200_v12, %v232_v18  ;;  %v252_v23 = vsel %vm220_vm15, %v204_v13, %v236_v19  ;;  %v160_v24 = vpop.f32.mrf.mxu2  ;;  %v170_v25 = vpop.f32.mrf.mxu3 }
  0xaf   :  { %275 = vst [vmem:[#allocation2 + $0x70] sm:$0xff] %v259_v21  ;;  %v188_v26 = vmul.f32 %v465_v14, %v160_v24  ;;  %v192_v27 = vmul.f32 %v465_v14, %v170_v25 }
  0xb0   :  { %264 = vst [vmem:[#allocation2 + $0x18] sm:$0xff] %v248_v22 }
  0xb1   :  { %268 = vst [vmem:[#allocation2 + $0x38] sm:$0xff] %v252_v23  ;;  %v208_v28 = vadd.f32 %v470_v15, %v188_v26  ;;  %v212_v29 = vadd.f32 %v470_v15, %v192_v27 }
  0xb3   :  { %vm224_vm0 = vcmp.ge.f32.partialorder %v208_v28, 0.0  ;;  %v240_v30 = vmul.f32 0.2, %v208_v28  ;;  %vm228_vm1 = vcmp.ge.f32.partialorder %v212_v29, 0.0  ;;  %v244_v31 = vmul.f32 0.2, %v212_v29 }
  0xb5   :  { %v256_v32 = vsel %vm224_vm0, %v208_v28, %v240_v30  ;;  %v260_v14 = vsel %vm228_vm1, %v212_v29, %v244_v31 }
  0xb6   :  { %272 = vst [vmem:[#allocation2 + $0x58] sm:$0xff] %v256_v32 }
  0xb7   :  { %276 = vst [vmem:[#allocation2 + $0x78] sm:$0xff] %v260_v14 }
  0xb8   :  { %289 = dma.vmem_to_hbm [thread:$0]  %s282_s2, 2048, %s284_s15, [#allocation3], %s394_s16, %s394_s16, %s395_s17  }
  0xb9   :  { %391 = dma.done.wait [#allocation3], 2048  }
  0xba   :  { %392 = vsyncadd [#allocation3], 4294965248 }
  0xbb   :  { %294 = vsyncpa [#allocation3], 1 }

</bundles_post_ra>
